<compile_context>
chip_gen: v5e
topology: v5e:2x2
jax: 0.10.0
libtpu: 0.0.40
codegen_flags: <defaults>
</compile_context>

<pallas_src>
import jax
import jax.numpy as jnp
from jax import lax
from jax.experimental import pallas as pl
from jax.experimental.pallas import tpu as pltpu


def _contrastive_loss_kernel(im_ref, s_ref, dcol_ref, drow_ref, out_ref):
    j = pl.program_id(1)

    # scores[m, n] = <im_i[m], s_j[n]>  (cosine_sim == plain dot product here).
    scores = lax.dot_general(
        im_ref[...], s_ref[...],
        dimension_numbers=(((1,), (1,)), ((), ())),
        preferred_element_type=jnp.float32)                  # [TM, TN] f32

    d1 = dcol_ref[...]                                       # [TM, 1]  diag(rows) - margin
    d2 = drow_ref[...]                                       # [1, TN]  diag(cols) - margin

    # cost_s + cost_im, reduced once.
    cost = jnp.maximum(scores - d1, 0.0) + jnp.maximum(scores - d2, 0.0)
    tile_total = jnp.sum(cost)

    @pl.when(j == 0)
    def _init():
        out_ref[...] = jnp.zeros_like(out_ref)

    out_ref[...] += tile_total


def _pick_tile(b):
    # MXU-native tile widths; the (1, T) diag-row block needs T % 128 == 0
    # (or T == B), so only 256/128 are considered before falling back.
    for t in (256, 128):
        if b % t == 0:
            return t
    return b


def contrastive_loss(im, s, margin=0.0):
    """im: [B, D], s: [B, D] -> scalar loss (float32).

    Matches ContrastiveLoss(margin, measure='cosine', max_violation=False):
    like the PyTorch module, assumes embeddings are already normalized, i.e.
    cosine_sim is a plain dot product.
    """
    assert im.ndim == 2 and s.shape == im.shape
    b, d = im.shape
    t = _pick_tile(b)
    gi = b // t

    # diag[k] = <im_k, s_k>; fold the margin in so the kernel epilogue is
    # just relu(scores - d).
    diag = (jnp.sum(im.astype(jnp.float32) * s.astype(jnp.float32), axis=1)
            - jnp.float32(margin))
    diag_col = diag[:, None]          # [B, 1]
    diag_row = diag[None, :]          # [1, B]

    partials = pl.pallas_call(
        _contrastive_loss_kernel,
        out_shape=jax.ShapeDtypeStruct((gi, 1, 1), jnp.float32),
        grid_spec=pltpu.PrefetchScalarGridSpec(
            num_scalar_prefetch=0,
            grid=(gi, gi),
            in_specs=[
                pl.BlockSpec((t, d), lambda i, j: (i, 0)),   # im row tile (resident over j)
                pl.BlockSpec((t, d), lambda i, j: (j, 0)),   # s  "column" tile
                pl.BlockSpec((t, 1), lambda i, j: (i, 0)),   # diag-margin as column
                pl.BlockSpec((1, t), lambda i, j: (0, j)),   # diag-margin as row
            ],
            out_specs=pl.BlockSpec((1, 1, 1), lambda i, j: (i, 0, 0)),
        ),
        compiler_params=pltpu.CompilerParams(
            # Per-i partial output -> i can be split across TensorCores;
            # j is the (resident-accumulator) reduction axis.
            dimension_semantics=("parallel", "arbitrary")),
    )(im, s, diag_col, diag_row)

    total = jnp.sum(partials)
    # Unmasked diagonal entries each contribute relu(margin) to cost_s and to
    # cost_im; subtract the static correction once.
    correction = 2.0 * float(b) * max(float(margin), 0.0)
    return total - jnp.float32(correction)


def _reference_loss(im, s, margin=0.0):
    scores = im @ s.T
    diag = jnp.diag(scores)
    cost_s = jnp.clip(margin + scores - diag[:, None], 0.0)
    cost_im = jnp.clip(margin + scores - diag[None, :], 0.0)
    eye = jnp.eye(scores.shape[0], dtype=bool)
    cost_s = jnp.where(eye, 0.0, cost_s)
    cost_im = jnp.where(eye, 0.0, cost_im)
    return jnp.sum(cost_s) + jnp.sum(cost_im)


if __name__ == "__main__":
    key = jax.random.PRNGKey(0)
    k1, k2, k3, k4 = jax.random.split(key, 4)

    # Case 1: small single-tile problem (matches the module's toy usage).
    B, D = 8, 32
    im = jax.random.normal(k1, (B, D), dtype=jnp.float32)
    s = jax.random.normal(k2, (B, D), dtype=jnp.float32)
    loss = contrastive_loss(im, s, margin=0.0)
    jax.block_until_ready(loss)
    ref = _reference_loss(im, s, margin=0.0)
    assert jnp.allclose(loss, ref, rtol=1e-4, atol=1e-4), (loss, ref)

    # Case 2: multi-tile 2x2 grid with nonzero margin (exercises the resident
    # per-row-tile accumulator, the parallel i axis, and the diagonal correction).
    B2, D2 = 512, 64
    im2 = jax.random.normal(k3, (B2, D2), dtype=jnp.float32)
    s2 = jax.random.normal(k4, (B2, D2), dtype=jnp.float32)
    loss2 = contrastive_loss(im2, s2, margin=0.2)
    jax.block_until_ready(loss2)
    ref2 = _reference_loss(im2, s2, margin=0.2)
    assert jnp.allclose(loss2, ref2, rtol=1e-4, atol=1e-4), (loss2, ref2)

    print("KERNEL_OK")
</pallas_src>

<mosaic_0001>
module attributes {stable_mosaic.version = 11 : i64} {
  func.func @_contrastive_loss_kernel(%arg0: i32, %arg1: i32, %arg2: memref<8x32xf32, #tpu.memory_space<vmem>>, %arg3: memref<8x32xf32, #tpu.memory_space<vmem>>, %arg4: memref<8x1xf32, #tpu.memory_space<vmem>>, %arg5: memref<1x8xf32, #tpu.memory_space<vmem>>, %arg6: memref<1x1x1xf32, #tpu.memory_space<vmem>>) attributes {dimension_semantics = [#tpu.dimension_semantics<parallel>, #tpu.dimension_semantics<arbitrary>], iteration_bounds = array<i64: 1, 1>, scalar_prefetch = 0 : i64, scratch_operands = 0 : i64, tpu.core_type = #tpu.core_type<tc>, window_params = [{transform_indices = @transform_0, window_bounds = array<i64: 8, 32>}, {transform_indices = @transform_1, window_bounds = array<i64: 8, 32>}, {transform_indices = @transform_2, window_bounds = array<i64: 8, 1>}, {transform_indices = @transform_3, window_bounds = array<i64: 1, 8>}, {transform_indices = @transform_4, window_bounds = array<i64: 1, 1, 1>}]} {
    %c0 = arith.constant 0 : index
    %c0_0 = arith.constant 0 : index
    %0 = vector.load %arg2[%c0, %c0_0] : memref<8x32xf32, #tpu.memory_space<vmem>>, vector<8x32xf32>
    %c0_1 = arith.constant 0 : index
    %c0_2 = arith.constant 0 : index
    %1 = vector.load %arg3[%c0_1, %c0_2] : memref<8x32xf32, #tpu.memory_space<vmem>>, vector<8x32xf32>
    %cst = arith.constant dense<0.000000e+00> : vector<8x8xf32>
    %2 = tpu.matmul %0, %1, %cst {dimension_numbers = #tpu.dot_dimension_numbers<[1], [1], [0], [0], [0, 0, 1, 0], [], []>} : vector<8x32xf32>, vector<8x32xf32>, vector<8x8xf32> -> vector<8x8xf32>
    %c0_3 = arith.constant 0 : index
    %c0_4 = arith.constant 0 : index
    %3 = vector.load %arg4[%c0_3, %c0_4] : memref<8x1xf32, #tpu.memory_space<vmem>>, vector<8x1xf32>
    %c0_5 = arith.constant 0 : index
    %c0_6 = arith.constant 0 : index
    %4 = vector.load %arg5[%c0_5, %c0_6] : memref<1x8xf32, #tpu.memory_space<vmem>>, vector<1x8xf32>
    %5 = vector.broadcast %3 : vector<8x1xf32> to vector<8x8xf32>
    %6 = arith.subf %2, %5 : vector<8x8xf32>
    %cst_7 = arith.constant 0.000000e+00 : f32
    %7 = vector.broadcast %cst_7 : f32 to vector<8x8xf32>
    %8 = arith.maximumf %6, %7 : vector<8x8xf32>
    %9 = vector.broadcast %4 : vector<1x8xf32> to vector<8x8xf32>
    %10 = arith.subf %2, %9 : vector<8x8xf32>
    %cst_8 = arith.constant 0.000000e+00 : f32
    %11 = vector.broadcast %cst_8 : f32 to vector<8x8xf32>
    %12 = arith.maximumf %10, %11 : vector<8x8xf32>
    %13 = arith.addf %8, %12 : vector<8x8xf32>
    %14 = vector.shape_cast %13 : vector<8x8xf32> to vector<1x8x8xf32>
    %cst_9 = arith.constant dense<0.000000e+00> : vector<1xf32>
    %15 = vector.multi_reduction <add>, %14, %cst_9 [1, 2] : vector<1x8x8xf32> to vector<1xf32>
    %16 = vector.shape_cast %15 : vector<1xf32> to vector<1x1x1xf32>
    %17 = vector.extract %16[0, 0, 0] : f32 from vector<1x1x1xf32>
    %c0_i32 = arith.constant 0 : i32
    %18 = arith.cmpi eq, %arg1, %c0_i32 : i32
    %19 = arith.extui %18 : i1 to i32
    %c0_i32_10 = arith.constant 0 : i32
    %20 = arith.cmpi ne, %19, %c0_i32_10 : i32
    scf.if %20 {
      %cst_17 = arith.constant 0.000000e+00 : f32
      %25 = vector.broadcast %cst_17 : f32 to vector<1x1x1xf32>
      %c0_18 = arith.constant 0 : index
      %c0_19 = arith.constant 0 : index
      %c0_20 = arith.constant 0 : index
      %26 = vector.load %arg6[%c0_18, %c0_19, %c0_20] : memref<1x1x1xf32, #tpu.memory_space<vmem>>, vector<1x1x1xf32>
      tpu.vector_store %arg6[%c0_18, %c0_19, %c0_20], %25 {strides = array<i32>} : memref<1x1x1xf32, #tpu.memory_space<vmem>>, vector<1x1x1xf32>,
    } else {
    }
    %c0_11 = arith.constant 0 : index
    %c0_12 = arith.constant 0 : index
    %c0_13 = arith.constant 0 : index
    %21 = vector.load %arg6[%c0_11, %c0_12, %c0_13] : memref<1x1x1xf32, #tpu.memory_space<vmem>>, vector<1x1x1xf32>
    %22 = vector.broadcast %17 : f32 to vector<1x1x1xf32>
    %23 = arith.addf %21, %22 : vector<1x1x1xf32>
    %c0_14 = arith.constant 0 : index
    %c0_15 = arith.constant 0 : index
    %c0_16 = arith.constant 0 : index
    %24 = vector.load %arg6[%c0_14, %c0_15, %c0_16] : memref<1x1x1xf32, #tpu.memory_space<vmem>>, vector<1x1x1xf32>
    tpu.vector_store %arg6[%c0_14, %c0_15, %c0_16], %23 {strides = array<i32>} : memref<1x1x1xf32, #tpu.memory_space<vmem>>, vector<1x1x1xf32>,
    return
  }
  func.func @transform_0(%arg0: i32, %arg1: i32) -> (i32, i32) {
    %c0_i32 = arith.constant 0 : i32
    %c0_i32_0 = arith.constant 0 : i32
    return %arg0, %c0_i32 : i32, i32
  }
  func.func @transform_1(%arg0: i32, %arg1: i32) -> (i32, i32) {
    %c0_i32 = arith.constant 0 : i32
    %c0_i32_0 = arith.constant 0 : i32
    return %arg1, %c0_i32 : i32, i32
  }
  func.func @transform_2(%arg0: i32, %arg1: i32) -> (i32, i32) {
    %c0_i32 = arith.constant 0 : i32
    %c0_i32_0 = arith.constant 0 : i32
    return %arg0, %c0_i32 : i32, i32
  }
  func.func @transform_3(%arg0: i32, %arg1: i32) -> (i32, i32) {
    %c0_i32 = arith.constant 0 : i32
    %c0_i32_0 = arith.constant 0 : i32
    return %c0_i32, %arg1 : i32, i32
  }
  func.func @transform_4(%arg0: i32, %arg1: i32) -> (i32, i32, i32) {
    %c0_i32 = arith.constant 0 : i32
    %c0_i32_0 = arith.constant 0 : i32
    %c0_i32_1 = arith.constant 0 : i32
    return %arg0, %c0_i32, %c0_i32_0 : i32, i32, i32
  }
}

</mosaic_0001>

<bundles_post_ra>
// kernel: tpu_custom_call.1
= control target key start
LH: loop header
LB: loop body
LE: loop exit
PB: predicated region body
PF: predicated region fallthrough
CT: control target
= control target key end

     0   :  { %9 = vsyncpa [#allocation3], 0  ;;  %s223_s0 = inlined_call_operand.vmem [shape: f32[8,32], index: 0, kind: input, shape index: {}]   ;;  %s224_s1 = inlined_call_operand.hbm [shape: f32[8,32], index: 1, kind: input, shape index: {}]   ;;  %s225_s2 = inlined_call_operand.vmem [shape: f32[8,1], index: 2, kind: input, shape index: {}]   ;;  %s226_s3 = inlined_call_operand.vmem [shape: f32[1,8], index: 3, kind: input, shape index: {}]   ;;  %s227_s4 = inlined_call_operand.hbm [shape: f32[1,1,1], index: 4, kind: output, shape index: {}]  }
   0x1   :  { %10 = vsyncpa [#allocation4], 0  ;;  %s18_s17 = sshll.u32 %s224_s1, 4  ;;  %s177_s18 = smov [#allocation2]   ;;  %s19_s17 = int_to_ptr.hbm [resolvable:$true] %s18_s17 }
   0x2   :  { %s20_s19 = sshll.u32 %s177_s18, 4  ;;  %s21_s19 = int_to_ptr.vmem [resolvable:$true] %s20_s19 }
   0x3   :  { %23 = dma.hbm_to_vmem [thread:$0]  %s19_s17, 128, %s21_s19, [#allocation3]  }
   0x4   :  { %173 = dma.done.wait [#allocation3], 128  }
   0x5   :  { %174 = vsyncadd [#allocation3], 4294967168  ;;  %vm91_vm0 = vcmask 0   ;;  %v178_v0 = vmov 0.0   ;;  %v179_v1 = vmov 0   ;;  %vm34_vm1 = vcmask 261120  }
   0x6   :  { %92 = vst.msk [vmem:[#allocation5] sm:$0x1] %vm91_vm0, %v178_v0  ;;  %123 = vset.pattern.permute.xlu0 %v179_v1  ;;  %v33_v2 = vld [vmem:[#allocation2] sm:$0xff]  ;;  %vm76_vm2 = vcmask 64512   ;;  %s105_s26 = sshll.u32 %s227_s4, 4  ;;  %s106_s26 = int_to_ptr.hbm [resolvable:$true] %s105_s26 }
   0x7   :  { %v61_v3 = vld [vmem:[%s225_s2] sm:$0xff]  ;;  %115 = vmatpush.xpose.msk.msra.mxu0 %vm34_vm1, %v33_v2 }
   0x8   :  { %v32_v4 = vld [vmem:[%s223_s0] sm:$0xff]  ;;  %65 = vperm.xlu0 %123, %v61_v3   ;;  %s180_s0 = smov [#allocation5]  }
   0x9   :  { %v124_v5 = vld [vmem:[%s226_s3] ss:$0 sm:$0xff]  ;;  %s103_s2 = sshll.u32 %s180_s0, 4  ;;  %s104_s2 = int_to_ptr.vmem [resolvable:$true] %s103_s2 }
   0xa   :  { %116 = vmatmul.msk.f32.vlgmr.msra.gmra.mxu0 %vm34_vm1, %v32_v4 }
   0xd   :  { %v93_v21 = vld [vmem:[#allocation5] sm:$0x1] }
  0x7a   :  { %v66_v6 = vpop.permute.xlu0 %65 }
  0x87   :  { %v58_v7 = vpop.f32.mrf.mxu0 }
  0x88   :  { %v68_v8 = vsub.f32 %v58_v7, %v66_v6  ;;  %v73_v9 = vsub.f32 %v58_v7, %v124_v5 }
  0x8a   :  { %v69_v10 = vmax.f32 %v68_v8, 0.0  ;;  %v74_v11 = vmax.f32 %v73_v9, 0.0 }
  0x8c   :  { %v75_v12 = vadd.f32 %v74_v11, %v69_v10 }
  0x8e   :  { %v77_v13 = vsel %vm76_vm2, %v75_v12, 0.0 }
  0x8f   :  { %78 = vadd.xlane.f32.xlu0 %v77_v13 }
 0x102   :  { %v79_v14 = vpop.xlane.xlu0 %78 }
 0x103   :  { %v80_v15 = vrot.slane %v79_v14, 4 }
 0x105   :  { %v81_v16 = vadd.f32 %v80_v15, %v79_v14 }
 0x107   :  { %v82_v17 = vrot.slane %v81_v16, 2 }
 0x109   :  { %v83_v18 = vadd.f32 %v82_v17, %v81_v16 }
 0x10b   :  { %v84_v19 = vrot.slane %v83_v18, 1 }
 0x10d   :  { %v85_v20 = vadd.f32 %v84_v19, %v83_v18 }
 0x10f   :  { %117 = vpush %v85_v20 }
 0x140   :  { %s118_s27 = spop %117 }
 0x141   :  { %v94_v22 = vstv %s118_s27 }
 0x142   :  { %v95_v23 = vadd.f32 %v94_v22, %v93_v21 }
 0x144   :  { %97 = vst.msk [vmem:[#allocation5] sm:$0x1] %vm91_vm0, %v95_v23 }
 0x145   :  { %108 = dma.vmem_to_hbm [thread:$0]  %s104_s2, 16, %s106_s26, [#allocation4]  }
 0x146   :  { %175 = dma.done.wait [#allocation4], 16  }
 0x147   :  { %176 = vsyncadd [#allocation4], 4294967280 }
 0x148   :  { %113 = vsyncpa [#allocation3], 1 }
 0x149   :  { %114 = vsyncpa [#allocation4], 1 }

</bundles_post_ra>
